<compile_context>
chip_gen: v5e
topology: v5e:2x2
jax: 0.10.0
libtpu: 0.0.40
codegen_flags: <defaults>
</compile_context>

<pallas_src>
import functools

import jax
import jax.numpy as jnp
from jax import lax
from jax.experimental import pallas as pl
from jax.experimental.pallas import tpu as pltpu


_LANES = 128                      # vreg lane width
_CHUNK_F32_BYTES = 256 * 1024     # per-chunk fp32 working set (~64 vregs/value)
_SMALL_TOTAL_BYTES = 1024 * 1024  # below this, use a single full-extent block
_MIN_GRID_STEPS = 4               # keep >= 4 steps so both v7x TCs get work


def _cdiv(a, b):
    return -(-a // b)


def _round_up(a, b):
    return _cdiv(a, b) * b


def _round_down(a, b):
    return (a // b) * b


def _vmem_capacity_bytes():
    """Physical VMEM of the attached TPU; conservative fallback if unknown."""
    try:
        cap = getattr(pltpu.get_tpu_info(), "vmem_capacity_bytes", None)
        if cap:
            return int(cap)
    except Exception:
        pass
    return 64 * 1024 * 1024       # assume the smallest (v7x-class) VMEM


def _layernorm_kernel(x_ref, gamma_ref, beta_ref, o_ref, *, eps, feat, groups,
                      chunk_rows, n_chunks):
    """Normalizes every `feat`-wide segment of each row of the block.

    groups == 1 : rows are laid out as (rows, feat)            (plain rows)
    groups  > 1 : rows are laid out as (rows, groups*feat): G logical rows are
                  lane-packed into one dense 128-lane row; the reduction is
                  done per feat-wide segment and broadcast back to its lanes.
    """
    lanes = x_ref.shape[-1]
    gamma = gamma_ref[...].astype(jnp.float32)        # (1, lanes)
    beta = beta_ref[...].astype(jnp.float32)          # (1, lanes)
    inv_n = 1.0 / feat
    n_minus_1 = float(feat - 1)   # 0.0 for feat == 1 -> NaN, matching torch.std

    if groups > 1:
        lane = lax.broadcasted_iota(jnp.int32, (1, lanes), 1)
        # Hoisted segment masks (avoids re-broadcasting inside the chunk loop).
        seg_masks = [
            jnp.logical_and(lane >= g * feat, lane < (g + 1) * feat)
            for g in range(groups)
        ]

    def process(row0):
        x = x_ref[pl.ds(row0, chunk_rows), :].astype(jnp.float32)
        if groups == 1:
            mean = jnp.sum(x, axis=-1, keepdims=True) * inv_n
            diff = x - mean
            var = jnp.sum(diff * diff, axis=-1, keepdims=True) / n_minus_1
        else:
            # Exact grouped two-pass reduction (fp32) per feat-wide lane segment.
            mean = jnp.zeros_like(x)
            for m in seg_masks:
                s = jnp.sum(jnp.where(m, x, 0.0), axis=-1, keepdims=True)
                mean = jnp.where(m, s * inv_n, mean)
            diff = x - mean
            d2 = diff * diff
            var = jnp.zeros_like(x)
            for m in seg_masks:
                ss = jnp.sum(jnp.where(m, d2, 0.0), axis=-1, keepdims=True)
                var = jnp.where(m, ss / n_minus_1, var)
        std = jnp.sqrt(var)                            # unbiased std (ddof=1)
        inv = pl.reciprocal(std + eps, approx=False)   # EUP, not a VALU divide
        y = diff * inv * gamma + beta
        o_ref[pl.ds(row0, chunk_rows), :] = y.astype(o_ref.dtype)

    if n_chunks == 1:
        process(0)
    else:
        def body(c, carry):
            process(pl.multiple_of(c * chunk_rows, chunk_rows))
            return carry
        lax.fori_loop(0, n_chunks, body, 0)


def layer_norm(x, gamma, beta, eps=1e-6):
    """x: (..., features); gamma, beta: (features,).

    Matches the GraphTransformer LayerNorm: unbiased std, eps added to std.
    """
    orig_shape = x.shape
    features = int(orig_shape[-1])
    rows = 1
    for d in orig_shape[:-1]:
        rows *= int(d)

    itemsize = jnp.dtype(x.dtype).itemsize
    sub = {4: 8, 2: 16, 1: 32}.get(itemsize, 8)       # packed-sublane multiple

    # ---- Lane packing for narrow feature dims (dense 128-lane rows) ---------
    groups = 1
    if features < _LANES and _LANES % features == 0:
        g = _LANES // features
        if g <= 8 and rows % g == 0:
            groups = g
    # TODO(synk): features < 16, or rows not divisible by the pack factor, still
    # take the narrow masked-store path; a remainder call / deeper packing would
    # be needed to make those fully lane-dense.
    lanes = features * groups
    p_rows = rows // groups

    x2 = x.reshape(p_rows, lanes)                      # metadata-only reshape
    if groups > 1:
        gamma2 = jnp.tile(gamma.reshape(-1), groups).reshape(1, lanes)
        beta2 = jnp.tile(beta.reshape(-1), groups).reshape(1, lanes)
    else:
        gamma2 = gamma.reshape(1, lanes)
        beta2 = beta.reshape(1, lanes)

    # ---- Per-generation block sizing (memory-bound: big blocks, bounded VMEM)
    if _vmem_capacity_bytes() >= 100 * 1024 * 1024:    # v5e / v6e class (128 MiB)
        target_block_bytes = 8 * 1024 * 1024
        vmem_limit_bytes = 96 * 1024 * 1024
    else:                                              # v7x class (64 MiB)
        target_block_bytes = 4 * 1024 * 1024
        vmem_limit_bytes = 48 * 1024 * 1024

    # VMEM rows are padded to 128 lanes; size against the padded footprint.
    row_store_bytes = _round_up(lanes, _LANES) * itemsize
    row_f32_bytes = _round_up(lanes, _LANES) * 4
    chunk_rows = max(sub, _round_down(_CHUNK_F32_BYTES // row_f32_bytes, sub))

    if p_rows * row_store_bytes <= _SMALL_TOTAL_BYTES or p_rows <= chunk_rows:
        # Tiny input: one full-extent block (always layout-legal).
        tile_rows = p_rows
        chunk_rows = p_rows
        n_chunks = 1
        grid_steps = 1
    else:
        # Biggest block within the per-generation byte budget ...
        tile_rows = max(chunk_rows,
                        _round_down(target_block_bytes // row_store_bytes,
                                    chunk_rows))
        # ... but keep >= _MIN_GRID_STEPS steps so the parallel axis shards
        # across both v7x TensorCores (and pipelining stays busy).
        split = _round_up(_cdiv(p_rows, _MIN_GRID_STEPS), chunk_rows)
        tile_rows = min(tile_rows, max(chunk_rows, split))
        grid_steps = _cdiv(p_rows, tile_rows)
        # Nudge toward an even step count (balanced megacore split) if possible.
        if grid_steps > 1 and grid_steps % 2 == 1:
            alt = max(chunk_rows,
                      _round_up(_cdiv(p_rows, grid_steps + 1), chunk_rows))
            if _cdiv(p_rows, alt) % 2 == 0:
                tile_rows = alt
                grid_steps = _cdiv(p_rows, alt)
        n_chunks = tile_rows // chunk_rows

    kernel = functools.partial(
        _layernorm_kernel, eps=float(eps), feat=features, groups=groups,
        chunk_rows=chunk_rows, n_chunks=n_chunks)

    out = pl.pallas_call(
        kernel,
        out_shape=jax.ShapeDtypeStruct((p_rows, lanes), x.dtype),
        grid_spec=pltpu.PrefetchScalarGridSpec(
            num_scalar_prefetch=0,
            grid=(grid_steps,),
            in_specs=[
                pl.BlockSpec((tile_rows, lanes), lambda i: (i, 0)),
                pl.BlockSpec((1, lanes), lambda i: (0, 0)),
                pl.BlockSpec((1, lanes), lambda i: (0, 0)),
            ],
            out_specs=pl.BlockSpec((tile_rows, lanes), lambda i: (i, 0)),
        ),
        compiler_params=pltpu.CompilerParams(
            dimension_semantics=("parallel",),
            vmem_limit_bytes=vmem_limit_bytes,
        ),
    )(x2, gamma2, beta2)

    return out.reshape(orig_shape)


def _reference(x, gamma, beta, eps):
    mean = jnp.mean(x, axis=-1, keepdims=True)
    var = jnp.sum((x - mean) ** 2, axis=-1, keepdims=True) / (x.shape[-1] - 1)
    std = jnp.sqrt(var)
    return gamma * (x - mean) / (std + eps) + beta


if __name__ == "__main__":
    key = jax.random.PRNGKey(0)
    eps = 1e-6

    cases = [
        (2, 8, 32),       # module-implied demo shape; lane-packed path (G=4)
        (2, 8, 200),      # plain path, non-pow2 feature dim
        (1, 40000, 32),   # packed + multi-step grid + chunk loop + edge block
        (3, 1000, 256),   # plain path, F >= 128, partial edge block
    ]
    for shape in cases:
        features = shape[-1]
        kx, kg, kb, key = jax.random.split(key, 4)
        x = jax.random.normal(kx, shape, dtype=jnp.float32)
        gamma = 1.0 + 0.1 * jax.random.normal(kg, (features,), dtype=jnp.float32)
        beta = 0.1 * jax.random.normal(kb, (features,), dtype=jnp.float32)

        out = jax.block_until_ready(layer_norm(x, gamma, beta, eps=eps))
        ref = _reference(x, gamma, beta, eps)
        assert out.shape == x.shape
        err = jnp.max(jnp.abs(out - ref))
        assert jnp.allclose(out, ref, atol=1e-5, rtol=1e-5), (
            f"mismatch vs reference for shape {shape}: max abs err {err}")

    print("KERNEL_OK")
</pallas_src>

<mosaic_0001>
module attributes {stable_mosaic.version = 11 : i64} {
  func.func @_layernorm_kernel(%arg0: i32, %arg1: memref<4x128xf32, #tpu.memory_space<vmem>>, %arg2: memref<1x128xf32, #tpu.memory_space<vmem>>, %arg3: memref<1x128xf32, #tpu.memory_space<vmem>>, %arg4: memref<4x128xf32, #tpu.memory_space<vmem>>) attributes {dimension_semantics = [#tpu.dimension_semantics<parallel>], iteration_bounds = array<i64: 1>, scalar_prefetch = 0 : i64, scratch_operands = 0 : i64, tpu.core_type = #tpu.core_type<tc>, window_params = [{transform_indices = @transform_0, window_bounds = array<i64: 4, 128>}, {pipeline_mode = #tpu.pipeline_mode<synchronous>, transform_indices = @transform_1, window_bounds = array<i64: 1, 128>}, {pipeline_mode = #tpu.pipeline_mode<synchronous>, transform_indices = @transform_2, window_bounds = array<i64: 1, 128>}, {transform_indices = @transform_3, window_bounds = array<i64: 4, 128>}]} {
    %c0 = arith.constant 0 : index
    %c0_0 = arith.constant 0 : index
    %0 = vector.load %arg2[%c0, %c0_0] : memref<1x128xf32, #tpu.memory_space<vmem>>, vector<1x128xf32>
    %c0_1 = arith.constant 0 : index
    %c0_2 = arith.constant 0 : index
    %1 = vector.load %arg3[%c0_1, %c0_2] : memref<1x128xf32, #tpu.memory_space<vmem>>, vector<1x128xf32>
    %2 = tpu.iota {dimensions = array<i32: 1>} : vector<1x128xi32>
    %c0_i32 = arith.constant 0 : i32
    %3 = vector.broadcast %c0_i32 : i32 to vector<1x128xi32>
    %4 = arith.cmpi sge, %2, %3 : vector<1x128xi32>
    %c32_i32 = arith.constant 32 : i32
    %5 = vector.broadcast %c32_i32 : i32 to vector<1x128xi32>
    %6 = arith.cmpi slt, %2, %5 : vector<1x128xi32>
    %7 = arith.andi %4, %6 : vector<1x128xi1>
    %c32_i32_3 = arith.constant 32 : i32
    %8 = vector.broadcast %c32_i32_3 : i32 to vector<1x128xi32>
    %9 = arith.cmpi sge, %2, %8 : vector<1x128xi32>
    %c64_i32 = arith.constant 64 : i32
    %10 = vector.broadcast %c64_i32 : i32 to vector<1x128xi32>
    %11 = arith.cmpi slt, %2, %10 : vector<1x128xi32>
    %12 = arith.andi %9, %11 : vector<1x128xi1>
    %c64_i32_4 = arith.constant 64 : i32
    %13 = vector.broadcast %c64_i32_4 : i32 to vector<1x128xi32>
    %14 = arith.cmpi sge, %2, %13 : vector<1x128xi32>
    %c96_i32 = arith.constant 96 : i32
    %15 = vector.broadcast %c96_i32 : i32 to vector<1x128xi32>
    %16 = arith.cmpi slt, %2, %15 : vector<1x128xi32>
    %17 = arith.andi %14, %16 : vector<1x128xi1>
    %c96_i32_5 = arith.constant 96 : i32
    %18 = vector.broadcast %c96_i32_5 : i32 to vector<1x128xi32>
    %19 = arith.cmpi sge, %2, %18 : vector<1x128xi32>
    %c128_i32 = arith.constant 128 : i32
    %20 = vector.broadcast %c128_i32 : i32 to vector<1x128xi32>
    %21 = arith.cmpi slt, %2, %20 : vector<1x128xi32>
    %22 = arith.andi %19, %21 : vector<1x128xi1>
    %c0_6 = arith.constant 0 : index
    %c0_7 = arith.constant 0 : index
    %23 = vector.load %arg1[%c0_6, %c0_7] : memref<4x128xf32, #tpu.memory_space<vmem>>, vector<4x128xf32>
    %cst = arith.constant 0.000000e+00 : f32
    %24 = vector.broadcast %cst : f32 to vector<4x128xf32>
    %cst_8 = arith.constant 0.000000e+00 : f32
    %25 = vector.shape_cast %7 : vector<1x128xi1> to vector<1x128xi1>
    %26 = vector.broadcast %25 : vector<1x128xi1> to vector<4x128xi1>
    %27 = vector.broadcast %cst_8 : f32 to vector<4x128xf32>
    %28 = arith.select %26, %23, %27 : vector<4x128xi1>, vector<4x128xf32>
    %cst_9 = arith.constant dense<0.000000e+00> : vector<4xf32>
    %29 = vector.multi_reduction <add>, %28, %cst_9 [1] : vector<4x128xf32> to vector<4xf32>
    %30 = vector.shape_cast %29 : vector<4xf32> to vector<4x1xf32>
    %cst_10 = arith.constant 3.125000e-02 : f32
    %31 = vector.broadcast %cst_10 : f32 to vector<4x1xf32>
    %32 = arith.mulf %30, %31 : vector<4x1xf32>
    %33 = vector.shape_cast %7 : vector<1x128xi1> to vector<1x128xi1>
    %34 = vector.broadcast %33 : vector<1x128xi1> to vector<4x128xi1>
    %35 = vector.shape_cast %32 : vector<4x1xf32> to vector<4x1xf32>
    %36 = vector.broadcast %35 : vector<4x1xf32> to vector<4x128xf32>
    %37 = arith.select %34, %36, %24 : vector<4x128xi1>, vector<4x128xf32>
    %cst_11 = arith.constant 0.000000e+00 : f32
    %38 = vector.shape_cast %12 : vector<1x128xi1> to vector<1x128xi1>
    %39 = vector.broadcast %38 : vector<1x128xi1> to vector<4x128xi1>
    %40 = vector.broadcast %cst_11 : f32 to vector<4x128xf32>
    %41 = arith.select %39, %23, %40 : vector<4x128xi1>, vector<4x128xf32>
    %cst_12 = arith.constant dense<0.000000e+00> : vector<4xf32>
    %42 = vector.multi_reduction <add>, %41, %cst_12 [1] : vector<4x128xf32> to vector<4xf32>
    %43 = vector.shape_cast %42 : vector<4xf32> to vector<4x1xf32>
    %cst_13 = arith.constant 3.125000e-02 : f32
    %44 = vector.broadcast %cst_13 : f32 to vector<4x1xf32>
    %45 = arith.mulf %43, %44 : vector<4x1xf32>
    %46 = vector.shape_cast %12 : vector<1x128xi1> to vector<1x128xi1>
    %47 = vector.broadcast %46 : vector<1x128xi1> to vector<4x128xi1>
    %48 = vector.shape_cast %45 : vector<4x1xf32> to vector<4x1xf32>
    %49 = vector.broadcast %48 : vector<4x1xf32> to vector<4x128xf32>
    %50 = arith.select %47, %49, %37 : vector<4x128xi1>, vector<4x128xf32>
    %cst_14 = arith.constant 0.000000e+00 : f32
    %51 = vector.shape_cast %17 : vector<1x128xi1> to vector<1x128xi1>
    %52 = vector.broadcast %51 : vector<1x128xi1> to vector<4x128xi1>
    %53 = vector.broadcast %cst_14 : f32 to vector<4x128xf32>
    %54 = arith.select %52, %23, %53 : vector<4x128xi1>, vector<4x128xf32>
    %cst_15 = arith.constant dense<0.000000e+00> : vector<4xf32>
    %55 = vector.multi_reduction <add>, %54, %cst_15 [1] : vector<4x128xf32> to vector<4xf32>
    %56 = vector.shape_cast %55 : vector<4xf32> to vector<4x1xf32>
    %cst_16 = arith.constant 3.125000e-02 : f32
    %57 = vector.broadcast %cst_16 : f32 to vector<4x1xf32>
    %58 = arith.mulf %56, %57 : vector<4x1xf32>
    %59 = vector.shape_cast %17 : vector<1x128xi1> to vector<1x128xi1>
    %60 = vector.broadcast %59 : vector<1x128xi1> to vector<4x128xi1>
    %61 = vector.shape_cast %58 : vector<4x1xf32> to vector<4x1xf32>
    %62 = vector.broadcast %61 : vector<4x1xf32> to vector<4x128xf32>
    %63 = arith.select %60, %62, %50 : vector<4x128xi1>, vector<4x128xf32>
    %cst_17 = arith.constant 0.000000e+00 : f32
    %64 = vector.shape_cast %22 : vector<1x128xi1> to vector<1x128xi1>
    %65 = vector.broadcast %64 : vector<1x128xi1> to vector<4x128xi1>
    %66 = vector.broadcast %cst_17 : f32 to vector<4x128xf32>
    %67 = arith.select %65, %23, %66 : vector<4x128xi1>, vector<4x128xf32>
    %cst_18 = arith.constant dense<0.000000e+00> : vector<4xf32>
    %68 = vector.multi_reduction <add>, %67, %cst_18 [1] : vector<4x128xf32> to vector<4xf32>
    %69 = vector.shape_cast %68 : vector<4xf32> to vector<4x1xf32>
    %cst_19 = arith.constant 3.125000e-02 : f32
    %70 = vector.broadcast %cst_19 : f32 to vector<4x1xf32>
    %71 = arith.mulf %69, %70 : vector<4x1xf32>
    %72 = vector.shape_cast %22 : vector<1x128xi1> to vector<1x128xi1>
    %73 = vector.broadcast %72 : vector<1x128xi1> to vector<4x128xi1>
    %74 = vector.shape_cast %71 : vector<4x1xf32> to vector<4x1xf32>
    %75 = vector.broadcast %74 : vector<4x1xf32> to vector<4x128xf32>
    %76 = arith.select %73, %75, %63 : vector<4x128xi1>, vector<4x128xf32>
    %77 = arith.subf %23, %76 : vector<4x128xf32>
    %78 = arith.mulf %77, %77 : vector<4x128xf32>
    %cst_20 = arith.constant 0.000000e+00 : f32
    %79 = vector.broadcast %cst_20 : f32 to vector<4x128xf32>
    %cst_21 = arith.constant 0.000000e+00 : f32
    %80 = vector.shape_cast %7 : vector<1x128xi1> to vector<1x128xi1>
    %81 = vector.broadcast %80 : vector<1x128xi1> to vector<4x128xi1>
    %82 = vector.broadcast %cst_21 : f32 to vector<4x128xf32>
    %83 = arith.select %81, %78, %82 : vector<4x128xi1>, vector<4x128xf32>
    %cst_22 = arith.constant dense<0.000000e+00> : vector<4xf32>
    %84 = vector.multi_reduction <add>, %83, %cst_22 [1] : vector<4x128xf32> to vector<4xf32>
    %85 = vector.shape_cast %84 : vector<4xf32> to vector<4x1xf32>
    %cst_23 = arith.constant 3.100000e+01 : f32
    %86 = vector.broadcast %cst_23 : f32 to vector<4x1xf32>
    %87 = arith.divf %85, %86 : vector<4x1xf32>
    %88 = vector.shape_cast %7 : vector<1x128xi1> to vector<1x128xi1>
    %89 = vector.broadcast %88 : vector<1x128xi1> to vector<4x128xi1>
    %90 = vector.shape_cast %87 : vector<4x1xf32> to vector<4x1xf32>
    %91 = vector.broadcast %90 : vector<4x1xf32> to vector<4x128xf32>
    %92 = arith.select %89, %91, %79 : vector<4x128xi1>, vector<4x128xf32>
    %cst_24 = arith.constant 0.000000e+00 : f32
    %93 = vector.shape_cast %12 : vector<1x128xi1> to vector<1x128xi1>
    %94 = vector.broadcast %93 : vector<1x128xi1> to vector<4x128xi1>
    %95 = vector.broadcast %cst_24 : f32 to vector<4x128xf32>
    %96 = arith.select %94, %78, %95 : vector<4x128xi1>, vector<4x128xf32>
    %cst_25 = arith.constant dense<0.000000e+00> : vector<4xf32>
    %97 = vector.multi_reduction <add>, %96, %cst_25 [1] : vector<4x128xf32> to vector<4xf32>
    %98 = vector.shape_cast %97 : vector<4xf32> to vector<4x1xf32>
    %cst_26 = arith.constant 3.100000e+01 : f32
    %99 = vector.broadcast %cst_26 : f32 to vector<4x1xf32>
    %100 = arith.divf %98, %99 : vector<4x1xf32>
    %101 = vector.shape_cast %12 : vector<1x128xi1> to vector<1x128xi1>
    %102 = vector.broadcast %101 : vector<1x128xi1> to vector<4x128xi1>
    %103 = vector.shape_cast %100 : vector<4x1xf32> to vector<4x1xf32>
    %104 = vector.broadcast %103 : vector<4x1xf32> to vector<4x128xf32>
    %105 = arith.select %102, %104, %92 : vector<4x128xi1>, vector<4x128xf32>
    %cst_27 = arith.constant 0.000000e+00 : f32
    %106 = vector.shape_cast %17 : vector<1x128xi1> to vector<1x128xi1>
    %107 = vector.broadcast %106 : vector<1x128xi1> to vector<4x128xi1>
    %108 = vector.broadcast %cst_27 : f32 to vector<4x128xf32>
    %109 = arith.select %107, %78, %108 : vector<4x128xi1>, vector<4x128xf32>
    %cst_28 = arith.constant dense<0.000000e+00> : vector<4xf32>
    %110 = vector.multi_reduction <add>, %109, %cst_28 [1] : vector<4x128xf32> to vector<4xf32>
    %111 = vector.shape_cast %110 : vector<4xf32> to vector<4x1xf32>
    %cst_29 = arith.constant 3.100000e+01 : f32
    %112 = vector.broadcast %cst_29 : f32 to vector<4x1xf32>
    %113 = arith.divf %111, %112 : vector<4x1xf32>
    %114 = vector.shape_cast %17 : vector<1x128xi1> to vector<1x128xi1>
    %115 = vector.broadcast %114 : vector<1x128xi1> to vector<4x128xi1>
    %116 = vector.shape_cast %113 : vector<4x1xf32> to vector<4x1xf32>
    %117 = vector.broadcast %116 : vector<4x1xf32> to vector<4x128xf32>
    %118 = arith.select %115, %117, %105 : vector<4x128xi1>, vector<4x128xf32>
    %cst_30 = arith.constant 0.000000e+00 : f32
    %119 = vector.shape_cast %22 : vector<1x128xi1> to vector<1x128xi1>
    %120 = vector.broadcast %119 : vector<1x128xi1> to vector<4x128xi1>
    %121 = vector.broadcast %cst_30 : f32 to vector<4x128xf32>
    %122 = arith.select %120, %78, %121 : vector<4x128xi1>, vector<4x128xf32>
    %cst_31 = arith.constant dense<0.000000e+00> : vector<4xf32>
    %123 = vector.multi_reduction <add>, %122, %cst_31 [1] : vector<4x128xf32> to vector<4xf32>
    %124 = vector.shape_cast %123 : vector<4xf32> to vector<4x1xf32>
    %cst_32 = arith.constant 3.100000e+01 : f32
    %125 = vector.broadcast %cst_32 : f32 to vector<4x1xf32>
    %126 = arith.divf %124, %125 : vector<4x1xf32>
    %127 = vector.shape_cast %22 : vector<1x128xi1> to vector<1x128xi1>
    %128 = vector.broadcast %127 : vector<1x128xi1> to vector<4x128xi1>
    %129 = vector.shape_cast %126 : vector<4x1xf32> to vector<4x1xf32>
    %130 = vector.broadcast %129 : vector<4x1xf32> to vector<4x128xf32>
    %131 = arith.select %128, %130, %118 : vector<4x128xi1>, vector<4x128xf32>
    %132 = math.sqrt %131 : vector<4x128xf32>
    %cst_33 = arith.constant 9.99999997E-7 : f32
    %133 = vector.broadcast %cst_33 : f32 to vector<4x128xf32>
    %134 = arith.addf %132, %133 : vector<4x128xf32>
    %135 = tpu.reciprocal %134 : vector<4x128xf32> -> vector<4x128xf32>
    %136 = arith.mulf %77, %135 : vector<4x128xf32>
    %137 = vector.broadcast %0 : vector<1x128xf32> to vector<4x128xf32>
    %138 = arith.mulf %136, %137 : vector<4x128xf32>
    %139 = vector.broadcast %1 : vector<1x128xf32> to vector<4x128xf32>
    %140 = arith.addf %138, %139 : vector<4x128xf32>
    %c0_34 = arith.constant 0 : index
    %c0_35 = arith.constant 0 : index
    %141 = vector.load %arg4[%c0_34, %c0_35] : memref<4x128xf32, #tpu.memory_space<vmem>>, vector<4x128xf32>
    tpu.vector_store %arg4[%c0_34, %c0_35], %140 {strides = array<i32>} : memref<4x128xf32, #tpu.memory_space<vmem>>, vector<4x128xf32>,
    return
  }
  func.func @transform_0(%arg0: i32) -> (i32, i32) {
    %c0_i32 = arith.constant 0 : i32
    %c0_i32_0 = arith.constant 0 : i32
    return %arg0, %c0_i32 : i32, i32
  }
  func.func @transform_1(%arg0: i32) -> (i32, i32) {
    %c0_i32 = arith.constant 0 : i32
    %c0_i32_0 = arith.constant 0 : i32
    %c0_i32_1 = arith.constant 0 : i32
    return %c0_i32, %c0_i32_0 : i32, i32
  }
  func.func @transform_2(%arg0: i32) -> (i32, i32) {
    %c0_i32 = arith.constant 0 : i32
    %c0_i32_0 = arith.constant 0 : i32
    %c0_i32_1 = arith.constant 0 : i32
    return %c0_i32, %c0_i32_0 : i32, i32
  }
  func.func @transform_3(%arg0: i32) -> (i32, i32) {
    %c0_i32 = arith.constant 0 : i32
    %c0_i32_0 = arith.constant 0 : i32
    return %arg0, %c0_i32 : i32, i32
  }
}

</mosaic_0001>

<bundles_post_ra>
// kernel: tpu_custom_call.1
= control target key start
LH: loop header
LB: loop body
LE: loop exit
PB: predicated region body
PF: predicated region fallthrough
CT: control target
= control target key end

     0   :  { %8 = vsyncpa [#allocation3], 0  ;;  %s368_s0 = inlined_call_operand.hbm [shape: f32[4,128], index: 0, kind: input, shape index: {}]   ;;  %s369_s1 = inlined_call_operand.hbm [shape: f32[1,128], index: 1, kind: input, shape index: {}]   ;;  %s370_s2 = inlined_call_operand.vmem [shape: f32[1,128], index: 2, kind: input, shape index: {}]   ;;  %s371_s3 = inlined_call_operand.hbm [shape: f32[4,128], index: 3, kind: output, shape index: {}]  }
   0x1   :  { %9 = vsyncpa [#allocation6], 0 }
   0x2   :  { %10 = vsyncpa [#allocation4], 0  ;;  %s16_s14 = sshll.u32 %s368_s0, 4  ;;  %s271_s15 = smov [#allocation2]   ;;  %s17_s14 = int_to_ptr.hbm [resolvable:$true] %s16_s14 }
   0x3   :  { %s18_s16 = sshll.u32 %s271_s15, 4  ;;  %s27_s19 = sshll.u32 %s369_s1, 4  ;;  %s19_s16 = int_to_ptr.vmem [resolvable:$true] %s18_s16  ;;  %s28_s19 = int_to_ptr.hbm [resolvable:$true] %s27_s19 }
   0x4   :  { %21 = dma.hbm_to_vmem [thread:$0]  %s17_s14, 64, %s19_s16, [#allocation3]  }
   0x5   :  { %s272_s20 = smov [#allocation5]  }
   0x6   :  { %s29_s21 = sshll.u32 %s272_s20, 4  ;;  %s30_s21 = int_to_ptr.vmem [resolvable:$true] %s29_s21 }
   0x7   :  { %32 = dma.hbm_to_vmem [thread:$0]  %s28_s19, 16, %s30_s21, [#allocation6]  }
   0x8   :  { %265 = dma.done.wait [#allocation3], 64  }
   0x9   :  { %266 = vsyncadd [#allocation3], 4294967232 }
   0xa   :  { %267 = dma.done.wait [#allocation6], 16  }
   0xb   :  { %268 = vsyncadd [#allocation6], 4294967280  ;;  %v45_v0 = vlaneseq  ;;  %vm63_vm4 = vcmask 1043456   ;;  %v59_v3 = vld [vmem:[#allocation2] sm:$0xf]  ;;  %v273_v35 = vmov 31.0  }
   0xc   :  { %187 = vrcp.f32 %v273_v35  ;;  %s274_s22 = smov [#allocation7]   ;;  %s170_s26 = sshll.u32 %s371_s3, 4  ;;  %s171_s26 = int_to_ptr.hbm [resolvable:$true] %s170_s26 }
   0xd   :  { %v301_v1 = vand.u32 127, %v45_v0  ;;  %s168_s23 = sshll.u32 %s274_s22, 4  ;;  %s169_s23 = int_to_ptr.vmem [resolvable:$true] %s168_s23 }
   0xf   :  { %vm53_vm0 = vcmp.ge.s32.totalorder %v301_v1, 64  ;;  %vm54_vm1 = vcmp.lt.s32.totalorder %v301_v1, 96  ;;  %vm48_vm2 = vcmp.lt.s32.totalorder %v301_v1, 32  ;;  %vm50_vm5 = vcmp.ge.s32.totalorder %v301_v1, 32 }
  0x10   :  { %vm306_vm3 = vmand %vm53_vm0, %vm54_vm1  ;;  %vm51_vm6 = vcmp.lt.s32.totalorder %v301_v1, 64  ;;  %v62_v4 = vsel %vm48_vm2, %v59_v3, 0.0  ;;  %vm56_vm8 = vcmp.ge.s32.totalorder %v301_v1, 96 }
  0x11   :  { %v79_v5 = vsel %vm306_vm3, %v59_v3, 0.0  ;;  %v64_v6 = vsel %vm63_vm4, %v62_v4, 0.0  ;;  %vm318_vm7 = vmand %vm50_vm5, %vm51_vm6  ;;  %v87_v10 = vsel %vm56_vm8, %v59_v3, 0.0 }
  0x12   :  { %v80_v7 = vsel %vm63_vm4, %v79_v5, 0.0  ;;  %65 = vadd.xlane.f32.xlu0 %v64_v6  ;;  %v71_v9 = vsel %vm318_vm7, %v59_v3, 0.0  ;;  %v88_v12 = vsel %vm63_vm4, %v87_v10, 0.0  ;;  %v188_v36 = vpop.eup %187  ;;  %v185_v10 = vld [vmem:[#allocation5] ss:$0 sm:$0xff] }
  0x13   :  { %81 = vadd.xlane.f32.xlu1 %v80_v7  ;;  %v72_v11 = vsel %vm63_vm4, %v71_v9, 0.0  ;;  %v100_v37 = vmul.f32 31.0, %v188_v36  ;;  %vm104_vm9 = vweird.f32 %v188_v36 }
  0x15   :  { %v101_v38 = vsub.f32 1.0, %v100_v37 }
  0x17   :  { %v102_v39 = vmul.f32 %v188_v36, %v101_v38 }
  0x19   :  { %v103_v40 = vadd.f32 %v188_v36, %v102_v39 }
  0x1a   :  { %73 = vadd.xlane.f32.xlu0 %v72_v11 }
  0x1b   :  { %89 = vadd.xlane.f32.xlu1 %v88_v12  ;;  %v105_v42 = vsel %vm104_vm9, %v188_v36, %v103_v40 }
  0x85   :  { %v66_v13 = vpop.xlane.xlu0 %65 }
  0x86   :  { %v82_v14 = vpop.xlane.xlu1 %81  ;;  %v67_v15 = vmul.f32 0.03125, %v66_v13  ;;  %v186_v13 = vld [vmem:[%s370_s2] ss:$0 sm:$0xff] }
  0x87   :  { %v83_v21 = vmul.f32 0.03125, %v82_v14 }
  0x88   :  { %v68_v20 = vsel %vm48_vm2, %v67_v15, 0.0 }
  0x8d   :  { %v74_v16 = vpop.xlane.xlu0 %73 }
  0x8e   :  { %v90_v17 = vpop.xlane.xlu1 %89  ;;  %v75_v18 = vmul.f32 0.03125, %v74_v16 }
  0x8f   :  { %v91_v19 = vmul.f32 0.03125, %v90_v17 }
  0x90   :  { %v76_v22 = vsel %vm318_vm7, %v75_v18, %v68_v20 }
  0x91   :  { %v84_v23 = vsel %vm306_vm3, %v83_v21, %v76_v22 }
  0x92   :  { %v92_v24 = vsel %vm56_vm8, %v91_v19, %v84_v23 }
  0x93   :  { %v337_v25 = vsub.f32 %v59_v3, %v92_v24 }
  0x95   :  { %v94_v26 = vmul.f32 %v337_v25, %v337_v25 }
  0x97   :  { %v120_v27 = vsel %vm56_vm8, %v94_v26, 0.0  ;;  %v114_v28 = vsel %vm306_vm3, %v94_v26, 0.0  ;;  %v95_v29 = vsel %vm48_vm2, %v94_v26, 0.0  ;;  %v108_v33 = vsel %vm318_vm7, %v94_v26, 0.0 }
  0x98   :  { %v121_v30 = vsel %vm63_vm4, %v120_v27, 0.0  ;;  %v115_v31 = vsel %vm63_vm4, %v114_v28, 0.0  ;;  %v96_v32 = vsel %vm63_vm4, %v95_v29, 0.0  ;;  %v109_v34 = vsel %vm63_vm4, %v108_v33, 0.0 }
  0x99   :  { %122 = vadd.xlane.f32.xlu1 %v121_v30  ;;  %116 = vadd.xlane.f32.xlu0 %v115_v31 }
  0x9a   :  { %97 = vadd.xlane.f32.xlu2 %v96_v32 }
  0xa2   :  { %110 = vadd.xlane.f32.xlu2 %v109_v34 }
 0x10c   :  { %v117_v44 = vpop.xlane.xlu0 %116  ;;  %v123_v45 = vpop.xlane.xlu1 %122 }
 0x10d   :  { %v98_v41 = vpop.xlane.xlu2 %97  ;;  %v118_v48 = vmul.f32 %v117_v44, %v105_v42  ;;  %v124_v50 = vmul.f32 %v123_v45, %v105_v42 }
 0x10e   :  { %v106_v43 = vmul.f32 %v105_v42, %v98_v41 }
 0x110   :  { %v107_v49 = vsel %vm48_vm2, %v106_v43, 0.0 }
 0x115   :  { %v111_v46 = vpop.xlane.xlu2 %110 }
 0x116   :  { %v112_v47 = vmul.f32 %v111_v46, %v105_v42 }
 0x118   :  { %v113_v51 = vsel %vm318_vm7, %v112_v47, %v107_v49 }
 0x119   :  { %v119_v52 = vsel %vm306_vm3, %v118_v48, %v113_v51 }
 0x11a   :  { %v125_v53 = vsel %vm56_vm8, %v124_v50, %v119_v52 }
 0x11b   :  { %189 = vrsqrt.f32 %v125_v53  ;;  %vm133_vm10 = vcmp.eq.f32.partialorder %v125_v53, inf  ;;  %v136_v61 = vand.u32 2147483648, %v125_v53  ;;  %vm135_vm11 = vcmp.eq.f32.partialorder %v125_v53, 0.0 }
 0x121   :  { %v190_v54 = vpop.eup %189 }
 0x122   :  { %v127_v55 = vmul.f32 %v190_v54, %v125_v53 }
 0x124   :  { %v128_v56 = vmul.f32 %v190_v54, %v127_v55 }
 0x126   :  { %v129_v57 = vmul.f32 0.5, %v128_v56 }
 0x128   :  { %v130_v58 = vsub.f32 1.5, %v129_v57 }
 0x12a   :  { %v131_v59 = vmul.f32 %v190_v54, %v130_v58 }
 0x12c   :  { %v132_v60 = vmul.f32 %v131_v59, %v125_v53 }
 0x12e   :  { %v134_v62 = vsel %vm133_vm10, %v125_v53, %v132_v60 }
 0x12f   :  { %v137_v63 = vsel %vm135_vm11, %v136_v61, %v134_v62 }
 0x130   :  { %v138_v0 = vadd.f32 1e-06, %v137_v63 }
 0x132   :  { %191 = vrcp.f32 %v138_v0  ;;  %v150_v1 = vand.u32 2147483648, %v138_v0  ;;  %v148_v6 = vand.u32 2147483647, %v138_v0  ;;  %vm144_vm13 = vweird.f32 %v138_v0 }
 0x134   :  { %v151_v8 = vor.u32 1.1754944e-38, %v150_v1  ;;  %vm149_vm15 = vcmp.eq.f32.partialorder %v148_v6, 8.507059e+37 }
 0x138   :  { %v192_v2 = vpop.eup %191 }
 0x139   :  { %v140_v3 = vmul.f32 %v192_v2, %v138_v0  ;;  %vm145_vm12 = vweird.f32 %v192_v2 }
 0x13a   :  { %vm146_vm14 = vmor %vm144_vm13, %vm145_vm12 }
 0x13b   :  { %v141_v4 = vsub.f32 1.0, %v140_v3 }
 0x13d   :  { %v142_v5 = vmul.f32 %v192_v2, %v141_v4 }
 0x13f   :  { %v143_v7 = vadd.f32 %v192_v2, %v142_v5 }
 0x141   :  { %v147_v9 = vsel %vm146_vm14, %v192_v2, %v143_v7 }
 0x142   :  { %v152_v11 = vsel %vm149_vm15, %v151_v8, %v147_v9 }
 0x143   :  { %v153_v12 = vmul.f32 %v152_v11, %v337_v25 }
 0x145   :  { %v157_v14 = vmul.f32 %v185_v10, %v153_v12 }
 0x147   :  { %v161_v15 = vadd.f32 %v186_v13, %v157_v14 }
 0x149   :  { %162 = vst [vmem:[#allocation7] sm:$0xf] %v161_v15 }
 0x14a   :  { %173 = dma.vmem_to_hbm [thread:$0]  %s169_s23, 64, %s171_s26, [#allocation4]  }
 0x14b   :  { %269 = dma.done.wait [#allocation4], 64  }
 0x14c   :  { %270 = vsyncadd [#allocation4], 4294967232 }
 0x14d   :  { %178 = vsyncpa [#allocation3], 1 }
 0x14e   :  { %179 = vsyncpa [#allocation6], 1 }
 0x14f   :  { %180 = vsyncpa [#allocation4], 1 }

</bundles_post_ra>
